<compile_context>
chip_gen: v6e
topology: v6e:2x2x1
jax: 0.10.0
libtpu: 0.0.40
codegen_flags: <defaults>
</compile_context>

<pallas_src>
import functools

import jax
import jax.numpy as jnp
from jax import lax
from jax.experimental import pallas as pl
from jax.experimental.pallas import tpu as pltpu

LANES = 128
CHUNK_ROWS = 512          # in-kernel chunk (bounds code size), multiple of 32
MAX_TILE_ROWS = 8192      # 4 MiB per f32 input block; multiple of CHUNK_ROWS
NUM_SPLITS = 2            # leading "parallel" axis -> 2 TensorCores on v7x
NUM_MOMENTS = 5           # sum a, sum b, sum ab, sum b^2, sum a^2


def _round_up(x, m):
    return (x + m - 1) // m * m


def _cdiv(a, b):
    return (a + b - 1) // b


def _min_sublanes(dtype):
    # min second-to-last block tile: 8 for 32-bit, 16 for bf16, 32 for int8/fp8
    return max(8, 32 // jnp.dtype(dtype).itemsize)


def _moments_kernel(shift_ref, a_ref, b_ref, out_ref,
                    s_a, s_b, s_ab, s_bb, s_aa,
                    *, rows, tile_rows, chunk_rows, blocks_per_split,
                    needs_mask):
    # "a" plays the metric's "s_hat" role, "b" the metric's "s_target" role.
    c = pl.program_id(0)
    t = pl.program_id(1)
    nt = pl.num_programs(1)

    @pl.when(t == 0)
    def _init():
        for s in (s_a, s_b, s_ab, s_bb, s_aa):
            s[...] = jnp.zeros_like(s)

    shift_a = shift_ref[0]
    shift_b = shift_ref[1]
    intended = c * blocks_per_split + t          # un-clamped block index
    n_chunks = tile_rows // chunk_rows

    def load_chunk(ci):
        r0 = pl.multiple_of(ci * chunk_rows, 8)
        av = a_ref[pl.ds(r0, chunk_rows), :].astype(jnp.float32) - shift_a
        bv = b_ref[pl.ds(r0, chunk_rows), :].astype(jnp.float32) - shift_b
        return av, bv

    def accumulate(av, bv):
        # Pure VPU vreg adds; the cross-sublane/lane reduce happens once,
        # in the wrapper.
        a3 = av.reshape(-1, 8, LANES)
        b3 = bv.reshape(-1, 8, LANES)
        s_a[...] += jnp.sum(a3, axis=0)
        s_b[...] += jnp.sum(b3, axis=0)
        s_ab[...] += jnp.sum(a3 * b3, axis=0)
        s_bb[...] += jnp.sum(b3 * b3, axis=0)
        s_aa[...] += jnp.sum(a3 * a3, axis=0)

    def run(masked):
        def body(ci, carry):
            av, bv = load_chunk(ci)
            if masked:
                row = (lax.broadcasted_iota(jnp.int32, av.shape, 0)
                       + intended * tile_rows + ci * chunk_rows)
                valid = row < rows
                # jnp.where (not a multiplicative mask) so garbage/NaN in the
                # out-of-range rows cannot leak into the moments.
                av = jnp.where(valid, av, 0.0)
                bv = jnp.where(valid, bv, 0.0)
            accumulate(av, bv)
            return carry
        lax.fori_loop(0, n_chunks, body, 0)

    if needs_mask:
        # Only the boundary block (partial rows) or a clamped duplicate block
        # (odd block count split over the 2-way axis) needs masking.
        is_full = (intended + 1) * tile_rows <= rows

        @pl.when(is_full)
        def _full():
            run(masked=False)

        @pl.when(jnp.logical_not(is_full))
        def _partial():
            run(masked=True)
    else:
        run(masked=False)

    @pl.when(t == nt - 1)
    def _writeback():
        for i, s in enumerate((s_a, s_b, s_ab, s_bb, s_aa)):
            out_ref[0, 8 * i:8 * i + 8, :] = s[...]


def si_ssdr(s_target, s_hat, *, max_tile_rows=MAX_TILE_ROWS):
    """Mirrors SI_SSDR.forward(s_target, s_hat), incl. the argument-role swap
    of _si_sdr_metric (s_target -> metric's s_hat, s_hat -> metric's s_target)."""
    a = s_target.reshape(-1)   # metric's "s_hat"
    b = s_hat.reshape(-1)      # metric's "s_target"
    n = a.shape[0]

    # Constant shift (first element of each input): centered moments are
    # shift-invariant, so this is exact while removing most of the f32
    # raw-moment cancellation for non-negative magnitudes at large N.
    shift_a = a[0].astype(jnp.float32)
    shift_b = b[0].astype(jnp.float32)
    shifts = jnp.stack([shift_a, shift_b])        # (2,) f32 -> SMEM

    rows = n // LANES
    tail = n - rows * LANES

    # Fold the <128-element tail in with a tiny JAX reduce instead of a
    # wrapper-side jnp.pad copy of the whole input.
    if tail:
        a_t = a[rows * LANES:].astype(jnp.float32) - shift_a
        b_t = b[rows * LANES:].astype(jnp.float32) - shift_b
        tail_moments = jnp.stack([a_t.sum(), b_t.sum(), (a_t * b_t).sum(),
                                  (b_t * b_t).sum(), (a_t * a_t).sum()])
    else:
        tail_moments = jnp.zeros((NUM_MOMENTS,), jnp.float32)

    if rows > 0:
        if tail:
            # TODO(synk): the prefix slice still copies ~n elements when n is
            # not lane-aligned; a fully copy-free unaligned path would need a
            # manual-DMA (memory_space=pl.ANY) kernel over the flat array.
            a_main = a[:rows * LANES].reshape(rows, LANES)
            b_main = b[:rows * LANES].reshape(rows, LANES)
        else:
            a_main = a.reshape(rows, LANES)        # pure bitcast, no copy
            b_main = b.reshape(rows, LANES)

        sub = _min_sublanes(a_main.dtype)
        chunk_rows = min(CHUNK_ROWS, _round_up(rows, sub))
        if _round_up(rows, chunk_rows) <= max_tile_rows:
            tile_rows = _round_up(rows, chunk_rows)
        else:
            tile_rows = max(chunk_rows,
                            max_tile_rows // chunk_rows * chunk_rows)

        n_blocks = _cdiv(rows, tile_rows)
        blocks_per_split = _cdiv(n_blocks, NUM_SPLITS)
        needs_mask = (rows % tile_rows != 0) or (n_blocks % NUM_SPLITS != 0)

        itemsize = jnp.dtype(a_main.dtype).itemsize
        block_bytes = tile_rows * LANES * itemsize
        # 2 inputs x 2 pipeline buffers + output/scratch/internal headroom.
        vmem_limit = int(max(16 << 20, min(100 << 20,
                                           4 * block_bytes + (4 << 20))))

        kernel = functools.partial(
            _moments_kernel, rows=rows, tile_rows=tile_rows,
            chunk_rows=chunk_rows, blocks_per_split=blocks_per_split,
            needs_mask=needs_mask)

        def in_map(c, t):
            # Clamp so a duplicated block (odd n_blocks over the 2-way split)
            # stays in bounds; its contribution is zeroed by the in-kernel mask.
            return (jnp.minimum(c * blocks_per_split + t, n_blocks - 1), 0)

        def out_map(c, t):
            return (c, 0, 0)

        partials = pl.pallas_call(
            kernel,
            out_shape=jax.ShapeDtypeStruct(
                (NUM_SPLITS, NUM_MOMENTS * 8, LANES), jnp.float32),
            grid_spec=pltpu.PrefetchScalarGridSpec(
                num_scalar_prefetch=0,
                grid=(NUM_SPLITS, blocks_per_split),
                in_specs=[
                    pl.BlockSpec(memory_space=pltpu.MemorySpace.SMEM),
                    pl.BlockSpec((tile_rows, LANES), in_map),
                    pl.BlockSpec((tile_rows, LANES), in_map),
                ],
                out_specs=pl.BlockSpec((1, NUM_MOMENTS * 8, LANES), out_map),
                scratch_shapes=[pltpu.VMEM((8, LANES), jnp.float32)
                                for _ in range(NUM_MOMENTS)]),
            compiler_params=pltpu.CompilerParams(
                dimension_semantics=("parallel", "arbitrary"),
                vmem_limit_bytes=vmem_limit),
        )(shifts, a_main, b_main)

        main_moments = partials.reshape(
            NUM_SPLITS, NUM_MOMENTS, -1).sum(axis=(0, 2))
    else:
        main_moments = jnp.zeros((NUM_MOMENTS,), jnp.float32)

    # ---- finalize (tiny scalar math, done in the wrapper) ----
    s = main_moments + tail_moments
    sum_a, sum_b, sum_ab, sum_bb, sum_aa = s[0], s[1], s[2], s[3], s[4]

    n_f = jnp.float32(n)
    eps = jnp.float32(1e-12)
    dot = sum_ab - sum_a * sum_b / n_f       # <a_c, b_c>
    eb = sum_bb - sum_b * sum_b / n_f        # ||b_c||^2
    ea = sum_aa - sum_a * sum_a / n_f        # ||a_c||^2

    alpha = dot / (eb + eps)
    s_energy = alpha * alpha * eb            # ||alpha * b_c||^2
    noise_energy = ea - 2.0 * alpha * dot + alpha * alpha * eb
    ratio = s_energy / (noise_energy + eps)
    return 10.0 * jnp.log10(ratio)


def _si_ssdr_ref(s_target, s_hat):
    """Pure-JAX replica of the PyTorch forward (for verification)."""
    a = s_target.astype(jnp.float32).reshape(-1)   # "s_hat" role
    b = s_hat.astype(jnp.float32).reshape(-1)      # "s_target" role
    a = a - jnp.mean(a)
    b = b - jnp.mean(b)
    b_scaled = jnp.sum(a * b) * b / (jnp.sum(b * b) + 1e-12)
    e_noise = a - b_scaled
    lin = jnp.sum(b_scaled * b_scaled) / (jnp.sum(e_noise * e_noise) + 1e-12)
    return 10.0 * jnp.log10(lin)


if __name__ == "__main__":
    key = jax.random.PRNGKey(0)
    k1, k2 = jax.random.split(key)
    # small spectrogram-like inputs: (batch=2, channels=4, freq=16, time=16)
    s_target = jax.random.uniform(k1, (2, 4, 16, 16), jnp.float32)
    s_hat = s_target + 0.1 * jax.random.normal(k2, (2, 4, 16, 16), jnp.float32)

    out = si_ssdr(s_target, s_hat)
    out = jax.block_until_ready(out)

    ref = _si_ssdr_ref(s_target, s_hat)
    assert out.shape == () and out.dtype == jnp.float32
    assert jnp.allclose(out, ref, rtol=1e-3, atol=1e-3), (out, ref)
    print("KERNEL_OK")
</pallas_src>

<mosaic_0001>
module attributes {stable_mosaic.version = 11 : i64} {
  func.func @_moments_kernel(%arg0: i32, %arg1: i32, %arg2: memref<2xf32, #tpu.memory_space<smem>>, %arg3: memref<16x128xf32, #tpu.memory_space<vmem>>, %arg4: memref<16x128xf32, #tpu.memory_space<vmem>>, %arg5: memref<1x40x128xf32, #tpu.memory_space<vmem>>, %arg6: memref<8x128xf32, #tpu.memory_space<vmem>>, %arg7: memref<8x128xf32, #tpu.memory_space<vmem>>, %arg8: memref<8x128xf32, #tpu.memory_space<vmem>>, %arg9: memref<8x128xf32, #tpu.memory_space<vmem>>, %arg10: memref<8x128xf32, #tpu.memory_space<vmem>>) attributes {dimension_semantics = [#tpu.dimension_semantics<parallel>, #tpu.dimension_semantics<arbitrary>], iteration_bounds = array<i64: 2, 1>, scalar_prefetch = 0 : i64, scratch_operands = 5 : i64, tpu.core_type = #tpu.core_type<tc>, window_params = [{transform_indices = @transform_0, window_bounds = array<i64: 2>}, {transform_indices = @transform_1, window_bounds = array<i64: 16, 128>}, {transform_indices = @transform_2, window_bounds = array<i64: 16, 128>}, {transform_indices = @transform_3, window_bounds = array<i64: 1, 40, 128>}]} {
    %c0_i32 = arith.constant 0 : i32
    %0 = arith.cmpi eq, %arg1, %c0_i32 : i32
    %1 = arith.extui %0 : i1 to i32
    %c0_i32_0 = arith.constant 0 : i32
    %2 = arith.cmpi ne, %1, %c0_i32_0 : i32
    scf.if %2 {
      %cst = arith.constant 0.000000e+00 : f32
      %18 = vector.broadcast %cst : f32 to vector<8x128xf32>
      %c0_7 = arith.constant 0 : index
      %c0_8 = arith.constant 0 : index
      %19 = vector.load %arg6[%c0_7, %c0_8] : memref<8x128xf32, #tpu.memory_space<vmem>>, vector<8x128xf32>
      tpu.vector_store %arg6[%c0_7, %c0_8], %18 {strides = array<i32>} : memref<8x128xf32, #tpu.memory_space<vmem>>, vector<8x128xf32>,
      %cst_9 = arith.constant 0.000000e+00 : f32
      %20 = vector.broadcast %cst_9 : f32 to vector<8x128xf32>
      %c0_10 = arith.constant 0 : index
      %c0_11 = arith.constant 0 : index
      %21 = vector.load %arg7[%c0_10, %c0_11] : memref<8x128xf32, #tpu.memory_space<vmem>>, vector<8x128xf32>
      tpu.vector_store %arg7[%c0_10, %c0_11], %20 {strides = array<i32>} : memref<8x128xf32, #tpu.memory_space<vmem>>, vector<8x128xf32>,
      %cst_12 = arith.constant 0.000000e+00 : f32
      %22 = vector.broadcast %cst_12 : f32 to vector<8x128xf32>
      %c0_13 = arith.constant 0 : index
      %c0_14 = arith.constant 0 : index
      %23 = vector.load %arg8[%c0_13, %c0_14] : memref<8x128xf32, #tpu.memory_space<vmem>>, vector<8x128xf32>
      tpu.vector_store %arg8[%c0_13, %c0_14], %22 {strides = array<i32>} : memref<8x128xf32, #tpu.memory_space<vmem>>, vector<8x128xf32>,
      %cst_15 = arith.constant 0.000000e+00 : f32
      %24 = vector.broadcast %cst_15 : f32 to vector<8x128xf32>
      %c0_16 = arith.constant 0 : index
      %c0_17 = arith.constant 0 : index
      %25 = vector.load %arg9[%c0_16, %c0_17] : memref<8x128xf32, #tpu.memory_space<vmem>>, vector<8x128xf32>
      tpu.vector_store %arg9[%c0_16, %c0_17], %24 {strides = array<i32>} : memref<8x128xf32, #tpu.memory_space<vmem>>, vector<8x128xf32>,
      %cst_18 = arith.constant 0.000000e+00 : f32
      %26 = vector.broadcast %cst_18 : f32 to vector<8x128xf32>
      %c0_19 = arith.constant 0 : index
      %c0_20 = arith.constant 0 : index
      %27 = vector.load %arg10[%c0_19, %c0_20] : memref<8x128xf32, #tpu.memory_space<vmem>>, vector<8x128xf32>
      tpu.vector_store %arg10[%c0_19, %c0_20], %26 {strides = array<i32>} : memref<8x128xf32, #tpu.memory_space<vmem>>, vector<8x128xf32>,
    } else {
    }
    %c0 = arith.constant 0 : index
    %3 = memref.load %arg2[%c0] : memref<2xf32, #tpu.memory_space<smem>>
    %c1 = arith.constant 1 : index
    %4 = memref.load %arg2[%c1] : memref<2xf32, #tpu.memory_space<smem>>
    %c1_i32 = arith.constant 1 : i32
    %5 = arith.muli %arg0, %c1_i32 : i32
    %6 = arith.addi %5, %arg1 : i32
    %c1_i32_1 = arith.constant 1 : i32
    %7 = arith.addi %6, %c1_i32_1 : i32
    %c16_i32 = arith.constant 16 : i32
    %8 = arith.muli %7, %c16_i32 : i32
    %c16_i32_2 = arith.constant 16 : i32
    %9 = arith.cmpi sle, %8, %c16_i32_2 : i32
    %10 = arith.extui %9 : i1 to i32
    %c0_i32_3 = arith.constant 0 : i32
    %11 = arith.cmpi ne, %10, %c0_i32_3 : i32
    scf.if %11 {
      %c0_i32_7 = arith.constant 0 : i32
      %c16_i32_8 = arith.constant 16 : i32
      %18 = arith.muli %c0_i32_7, %c16_i32_8 : i32
      %19 = tpu.assume_multiple %18, 8 : i32
      %20 = arith.index_cast %19 : i32 to index
      %c0_9 = arith.constant 0 : index
      %21 = vector.load %arg3[%20, %c0_9] : memref<16x128xf32, #tpu.memory_space<vmem>>, vector<16x128xf32>
      %22 = vector.broadcast %3 : f32 to vector<16x128xf32>
      %23 = arith.subf %21, %22 : vector<16x128xf32>
      %24 = arith.index_cast %19 : i32 to index
      %c0_10 = arith.constant 0 : index
      %25 = vector.load %arg4[%24, %c0_10] : memref<16x128xf32, #tpu.memory_space<vmem>>, vector<16x128xf32>
      %26 = vector.broadcast %4 : f32 to vector<16x128xf32>
      %27 = arith.subf %25, %26 : vector<16x128xf32>
      %28 = vector.shape_cast %23 : vector<16x128xf32> to vector<2x8x128xf32>
      %29 = vector.shape_cast %27 : vector<16x128xf32> to vector<2x8x128xf32>
      %c0_11 = arith.constant 0 : index
      %c0_12 = arith.constant 0 : index
      %30 = vector.load %arg6[%c0_11, %c0_12] : memref<8x128xf32, #tpu.memory_space<vmem>>, vector<8x128xf32>
      %cst = arith.constant dense<0.000000e+00> : vector<8x128xf32>
      %31 = vector.multi_reduction <add>, %28, %cst [0] : vector<2x8x128xf32> to vector<8x128xf32>
      %32 = arith.addf %30, %31 : vector<8x128xf32>
      %c0_13 = arith.constant 0 : index
      %c0_14 = arith.constant 0 : index
      %33 = vector.load %arg6[%c0_13, %c0_14] : memref<8x128xf32, #tpu.memory_space<vmem>>, vector<8x128xf32>
      tpu.vector_store %arg6[%c0_13, %c0_14], %32 {strides = array<i32>} : memref<8x128xf32, #tpu.memory_space<vmem>>, vector<8x128xf32>,
      %c0_15 = arith.constant 0 : index
      %c0_16 = arith.constant 0 : index
      %34 = vector.load %arg7[%c0_15, %c0_16] : memref<8x128xf32, #tpu.memory_space<vmem>>, vector<8x128xf32>
      %cst_17 = arith.constant dense<0.000000e+00> : vector<8x128xf32>
      %35 = vector.multi_reduction <add>, %29, %cst_17 [0] : vector<2x8x128xf32> to vector<8x128xf32>
      %36 = arith.addf %34, %35 : vector<8x128xf32>
      %c0_18 = arith.constant 0 : index
      %c0_19 = arith.constant 0 : index
      %37 = vector.load %arg7[%c0_18, %c0_19] : memref<8x128xf32, #tpu.memory_space<vmem>>, vector<8x128xf32>
      tpu.vector_store %arg7[%c0_18, %c0_19], %36 {strides = array<i32>} : memref<8x128xf32, #tpu.memory_space<vmem>>, vector<8x128xf32>,
      %c0_20 = arith.constant 0 : index
      %c0_21 = arith.constant 0 : index
      %38 = vector.load %arg8[%c0_20, %c0_21] : memref<8x128xf32, #tpu.memory_space<vmem>>, vector<8x128xf32>
      %39 = arith.mulf %28, %29 : vector<2x8x128xf32>
      %cst_22 = arith.constant dense<0.000000e+00> : vector<8x128xf32>
      %40 = vector.multi_reduction <add>, %39, %cst_22 [0] : vector<2x8x128xf32> to vector<8x128xf32>
      %41 = arith.addf %38, %40 : vector<8x128xf32>
      %c0_23 = arith.constant 0 : index
      %c0_24 = arith.constant 0 : index
      %42 = vector.load %arg8[%c0_23, %c0_24] : memref<8x128xf32, #tpu.memory_space<vmem>>, vector<8x128xf32>
      tpu.vector_store %arg8[%c0_23, %c0_24], %41 {strides = array<i32>} : memref<8x128xf32, #tpu.memory_space<vmem>>, vector<8x128xf32>,
      %c0_25 = arith.constant 0 : index
      %c0_26 = arith.constant 0 : index
      %43 = vector.load %arg9[%c0_25, %c0_26] : memref<8x128xf32, #tpu.memory_space<vmem>>, vector<8x128xf32>
      %44 = arith.mulf %29, %29 : vector<2x8x128xf32>
      %cst_27 = arith.constant dense<0.000000e+00> : vector<8x128xf32>
      %45 = vector.multi_reduction <add>, %44, %cst_27 [0] : vector<2x8x128xf32> to vector<8x128xf32>
      %46 = arith.addf %43, %45 : vector<8x128xf32>
      %c0_28 = arith.constant 0 : index
      %c0_29 = arith.constant 0 : index
      %47 = vector.load %arg9[%c0_28, %c0_29] : memref<8x128xf32, #tpu.memory_space<vmem>>, vector<8x128xf32>
      tpu.vector_store %arg9[%c0_28, %c0_29], %46 {strides = array<i32>} : memref<8x128xf32, #tpu.memory_space<vmem>>, vector<8x128xf32>,
      %c0_30 = arith.constant 0 : index
      %c0_31 = arith.constant 0 : index
      %48 = vector.load %arg10[%c0_30, %c0_31] : memref<8x128xf32, #tpu.memory_space<vmem>>, vector<8x128xf32>
      %49 = arith.mulf %28, %28 : vector<2x8x128xf32>
      %cst_32 = arith.constant dense<0.000000e+00> : vector<8x128xf32>
      %50 = vector.multi_reduction <add>, %49, %cst_32 [0] : vector<2x8x128xf32> to vector<8x128xf32>
      %51 = arith.addf %48, %50 : vector<8x128xf32>
      %c0_33 = arith.constant 0 : index
      %c0_34 = arith.constant 0 : index
      %52 = vector.load %arg10[%c0_33, %c0_34] : memref<8x128xf32, #tpu.memory_space<vmem>>, vector<8x128xf32>
      tpu.vector_store %arg10[%c0_33, %c0_34], %51 {strides = array<i32>} : memref<8x128xf32, #tpu.memory_space<vmem>>, vector<8x128xf32>,
      %c1_i32_35 = arith.constant 1 : i32
    } else {
    }
    %true = arith.constant true
    %12 = arith.xori %9, %true : i1
    %13 = arith.extui %12 : i1 to i32
    %c0_i32_4 = arith.constant 0 : i32
    %14 = arith.cmpi ne, %13, %c0_i32_4 : i32
    scf.if %14 {
      %c0_i32_7 = arith.constant 0 : i32
      %c16_i32_8 = arith.constant 16 : i32
      %18 = arith.muli %c0_i32_7, %c16_i32_8 : i32
      %19 = tpu.assume_multiple %18, 8 : i32
      %20 = arith.index_cast %19 : i32 to index
      %c0_9 = arith.constant 0 : index
      %21 = vector.load %arg3[%20, %c0_9] : memref<16x128xf32, #tpu.memory_space<vmem>>, vector<16x128xf32>
      %22 = vector.broadcast %3 : f32 to vector<16x128xf32>
      %23 = arith.subf %21, %22 : vector<16x128xf32>
      %24 = arith.index_cast %19 : i32 to index
      %c0_10 = arith.constant 0 : index
      %25 = vector.load %arg4[%24, %c0_10] : memref<16x128xf32, #tpu.memory_space<vmem>>, vector<16x128xf32>
      %26 = vector.broadcast %4 : f32 to vector<16x128xf32>
      %27 = arith.subf %25, %26 : vector<16x128xf32>
      %28 = tpu.iota {dimensions = array<i32: 0>} : vector<16x128xi32>
      %c16_i32_11 = arith.constant 16 : i32
      %29 = arith.muli %6, %c16_i32_11 : i32
      %30 = vector.broadcast %29 : i32 to vector<16x128xi32>
      %31 = arith.addi %28, %30 : vector<16x128xi32>
      %c16_i32_12 = arith.constant 16 : i32
      %32 = arith.muli %c0_i32_7, %c16_i32_12 : i32
      %33 = vector.broadcast %32 : i32 to vector<16x128xi32>
      %34 = arith.addi %31, %33 : vector<16x128xi32>
      %c16_i32_13 = arith.constant 16 : i32
      %35 = vector.broadcast %c16_i32_13 : i32 to vector<16x128xi32>
      %36 = arith.cmpi slt, %34, %35 : vector<16x128xi32>
      %cst = arith.constant 0.000000e+00 : f32
      %37 = vector.broadcast %cst : f32 to vector<16x128xf32>
      %38 = arith.select %36, %23, %37 : vector<16x128xi1>, vector<16x128xf32>
      %cst_14 = arith.constant 0.000000e+00 : f32
      %39 = vector.broadcast %cst_14 : f32 to vector<16x128xf32>
      %40 = arith.select %36, %27, %39 : vector<16x128xi1>, vector<16x128xf32>
      %41 = vector.shape_cast %38 : vector<16x128xf32> to vector<2x8x128xf32>
      %42 = vector.shape_cast %40 : vector<16x128xf32> to vector<2x8x128xf32>
      %c0_15 = arith.constant 0 : index
      %c0_16 = arith.constant 0 : index
      %43 = vector.load %arg6[%c0_15, %c0_16] : memref<8x128xf32, #tpu.memory_space<vmem>>, vector<8x128xf32>
      %cst_17 = arith.constant dense<0.000000e+00> : vector<8x128xf32>
      %44 = vector.multi_reduction <add>, %41, %cst_17 [0] : vector<2x8x128xf32> to vector<8x128xf32>
      %45 = arith.addf %43, %44 : vector<8x128xf32>
      %c0_18 = arith.constant 0 : index
      %c0_19 = arith.constant 0 : index
      %46 = vector.load %arg6[%c0_18, %c0_19] : memref<8x128xf32, #tpu.memory_space<vmem>>, vector<8x128xf32>
      tpu.vector_store %arg6[%c0_18, %c0_19], %45 {strides = array<i32>} : memref<8x128xf32, #tpu.memory_space<vmem>>, vector<8x128xf32>,
      %c0_20 = arith.constant 0 : index
      %c0_21 = arith.constant 0 : index
      %47 = vector.load %arg7[%c0_20, %c0_21] : memref<8x128xf32, #tpu.memory_space<vmem>>, vector<8x128xf32>
      %cst_22 = arith.constant dense<0.000000e+00> : vector<8x128xf32>
      %48 = vector.multi_reduction <add>, %42, %cst_22 [0] : vector<2x8x128xf32> to vector<8x128xf32>
      %49 = arith.addf %47, %48 : vector<8x128xf32>
      %c0_23 = arith.constant 0 : index
      %c0_24 = arith.constant 0 : index
      %50 = vector.load %arg7[%c0_23, %c0_24] : memref<8x128xf32, #tpu.memory_space<vmem>>, vector<8x128xf32>
      tpu.vector_store %arg7[%c0_23, %c0_24], %49 {strides = array<i32>} : memref<8x128xf32, #tpu.memory_space<vmem>>, vector<8x128xf32>,
      %c0_25 = arith.constant 0 : index
      %c0_26 = arith.constant 0 : index
      %51 = vector.load %arg8[%c0_25, %c0_26] : memref<8x128xf32, #tpu.memory_space<vmem>>, vector<8x128xf32>
      %52 = arith.mulf %41, %42 : vector<2x8x128xf32>
      %cst_27 = arith.constant dense<0.000000e+00> : vector<8x128xf32>
      %53 = vector.multi_reduction <add>, %52, %cst_27 [0] : vector<2x8x128xf32> to vector<8x128xf32>
      %54 = arith.addf %51, %53 : vector<8x128xf32>
      %c0_28 = arith.constant 0 : index
      %c0_29 = arith.constant 0 : index
      %55 = vector.load %arg8[%c0_28, %c0_29] : memref<8x128xf32, #tpu.memory_space<vmem>>, vector<8x128xf32>
      tpu.vector_store %arg8[%c0_28, %c0_29], %54 {strides = array<i32>} : memref<8x128xf32, #tpu.memory_space<vmem>>, vector<8x128xf32>,
      %c0_30 = arith.constant 0 : index
      %c0_31 = arith.constant 0 : index
      %56 = vector.load %arg9[%c0_30, %c0_31] : memref<8x128xf32, #tpu.memory_space<vmem>>, vector<8x128xf32>
      %57 = arith.mulf %42, %42 : vector<2x8x128xf32>
      %cst_32 = arith.constant dense<0.000000e+00> : vector<8x128xf32>
      %58 = vector.multi_reduction <add>, %57, %cst_32 [0] : vector<2x8x128xf32> to vector<8x128xf32>
      %59 = arith.addf %56, %58 : vector<8x128xf32>
      %c0_33 = arith.constant 0 : index
      %c0_34 = arith.constant 0 : index
      %60 = vector.load %arg9[%c0_33, %c0_34] : memref<8x128xf32, #tpu.memory_space<vmem>>, vector<8x128xf32>
      tpu.vector_store %arg9[%c0_33, %c0_34], %59 {strides = array<i32>} : memref<8x128xf32, #tpu.memory_space<vmem>>, vector<8x128xf32>,
      %c0_35 = arith.constant 0 : index
      %c0_36 = arith.constant 0 : index
      %61 = vector.load %arg10[%c0_35, %c0_36] : memref<8x128xf32, #tpu.memory_space<vmem>>, vector<8x128xf32>
      %62 = arith.mulf %41, %41 : vector<2x8x128xf32>
      %cst_37 = arith.constant dense<0.000000e+00> : vector<8x128xf32>
      %63 = vector.multi_reduction <add>, %62, %cst_37 [0] : vector<2x8x128xf32> to vector<8x128xf32>
      %64 = arith.addf %61, %63 : vector<8x128xf32>
      %c0_38 = arith.constant 0 : index
      %c0_39 = arith.constant 0 : index
      %65 = vector.load %arg10[%c0_38, %c0_39] : memref<8x128xf32, #tpu.memory_space<vmem>>, vector<8x128xf32>
      tpu.vector_store %arg10[%c0_38, %c0_39], %64 {strides = array<i32>} : memref<8x128xf32, #tpu.memory_space<vmem>>, vector<8x128xf32>,
      %c1_i32_40 = arith.constant 1 : i32
    } else {
    }
    %c0_i32_5 = arith.constant 0 : i32
    %15 = arith.cmpi eq, %arg1, %c0_i32_5 : i32
    %16 = arith.extui %15 : i1 to i32
    %c0_i32_6 = arith.constant 0 : i32
    %17 = arith.cmpi ne, %16, %c0_i32_6 : i32
    scf.if %17 {
      %c0_7 = arith.constant 0 : index
      %c0_8 = arith.constant 0 : index
      %18 = vector.load %arg6[%c0_7, %c0_8] : memref<8x128xf32, #tpu.memory_space<vmem>>, vector<8x128xf32>
      %c0_9 = arith.constant 0 : index
      %c0_10 = arith.constant 0 : index
      %c0_11 = arith.constant 0 : index
      %19 = vector.load %arg5[%c0_9, %c0_10, %c0_11] : memref<1x40x128xf32, #tpu.memory_space<vmem>>, vector<1x8x128xf32>
      %20 = vector.shape_cast %19 : vector<1x8x128xf32> to vector<8x128xf32>
      %21 = vector.shape_cast %18 : vector<8x128xf32> to vector<1x8x128xf32>
      tpu.vector_store %arg5[%c0_9, %c0_10, %c0_11], %21 {strides = array<i32>} : memref<1x40x128xf32, #tpu.memory_space<vmem>>, vector<1x8x128xf32>,
      %c0_12 = arith.constant 0 : index
      %c0_13 = arith.constant 0 : index
      %22 = vector.load %arg7[%c0_12, %c0_13] : memref<8x128xf32, #tpu.memory_space<vmem>>, vector<8x128xf32>
      %c0_14 = arith.constant 0 : index
      %c8 = arith.constant 8 : index
      %c0_15 = arith.constant 0 : index
      %23 = vector.load %arg5[%c0_14, %c8, %c0_15] : memref<1x40x128xf32, #tpu.memory_space<vmem>>, vector<1x8x128xf32>
      %24 = vector.shape_cast %23 : vector<1x8x128xf32> to vector<8x128xf32>
      %25 = vector.shape_cast %22 : vector<8x128xf32> to vector<1x8x128xf32>
      tpu.vector_store %arg5[%c0_14, %c8, %c0_15], %25 {strides = array<i32>} : memref<1x40x128xf32, #tpu.memory_space<vmem>>, vector<1x8x128xf32>,
      %c0_16 = arith.constant 0 : index
      %c0_17 = arith.constant 0 : index
      %26 = vector.load %arg8[%c0_16, %c0_17] : memref<8x128xf32, #tpu.memory_space<vmem>>, vector<8x128xf32>
      %c0_18 = arith.constant 0 : index
      %c16 = arith.constant 16 : index
      %c0_19 = arith.constant 0 : index
      %27 = vector.load %arg5[%c0_18, %c16, %c0_19] : memref<1x40x128xf32, #tpu.memory_space<vmem>>, vector<1x8x128xf32>
      %28 = vector.shape_cast %27 : vector<1x8x128xf32> to vector<8x128xf32>
      %29 = vector.shape_cast %26 : vector<8x128xf32> to vector<1x8x128xf32>
      tpu.vector_store %arg5[%c0_18, %c16, %c0_19], %29 {strides = array<i32>} : memref<1x40x128xf32, #tpu.memory_space<vmem>>, vector<1x8x128xf32>,
      %c0_20 = arith.constant 0 : index
      %c0_21 = arith.constant 0 : index
      %30 = vector.load %arg9[%c0_20, %c0_21] : memref<8x128xf32, #tpu.memory_space<vmem>>, vector<8x128xf32>
      %c0_22 = arith.constant 0 : index
      %c24 = arith.constant 24 : index
      %c0_23 = arith.constant 0 : index
      %31 = vector.load %arg5[%c0_22, %c24, %c0_23] : memref<1x40x128xf32, #tpu.memory_space<vmem>>, vector<1x8x128xf32>
      %32 = vector.shape_cast %31 : vector<1x8x128xf32> to vector<8x128xf32>
      %33 = vector.shape_cast %30 : vector<8x128xf32> to vector<1x8x128xf32>
      tpu.vector_store %arg5[%c0_22, %c24, %c0_23], %33 {strides = array<i32>} : memref<1x40x128xf32, #tpu.memory_space<vmem>>, vector<1x8x128xf32>,
      %c0_24 = arith.constant 0 : index
      %c0_25 = arith.constant 0 : index
      %34 = vector.load %arg10[%c0_24, %c0_25] : memref<8x128xf32, #tpu.memory_space<vmem>>, vector<8x128xf32>
      %c0_26 = arith.constant 0 : index
      %c32 = arith.constant 32 : index
      %c0_27 = arith.constant 0 : index
      %35 = vector.load %arg5[%c0_26, %c32, %c0_27] : memref<1x40x128xf32, #tpu.memory_space<vmem>>, vector<1x8x128xf32>
      %36 = vector.shape_cast %35 : vector<1x8x128xf32> to vector<8x128xf32>
      %37 = vector.shape_cast %34 : vector<8x128xf32> to vector<1x8x128xf32>
      tpu.vector_store %arg5[%c0_26, %c32, %c0_27], %37 {strides = array<i32>} : memref<1x40x128xf32, #tpu.memory_space<vmem>>, vector<1x8x128xf32>,
    } else {
    }
    return
  }
  func.func @transform_0(%arg0: i32, %arg1: i32) -> i32 {
    %c0_i32 = arith.constant 0 : i32
    %c0_i32_0 = arith.constant 0 : i32
    return %c0_i32 : i32
  }
  func.func @transform_1(%arg0: i32, %arg1: i32) -> (i32, i32) {
    %c1_i32 = arith.constant 1 : i32
    %0 = arith.muli %arg0, %c1_i32 : i32
    %1 = arith.addi %0, %arg1 : i32
    %c0_i32 = arith.constant 0 : i32
    %2 = arith.minsi %1, %c0_i32 : i32
    %c0_i32_0 = arith.constant 0 : i32
    %c0_i32_1 = arith.constant 0 : i32
    return %2, %c0_i32_0 : i32, i32
  }
  func.func @transform_2(%arg0: i32, %arg1: i32) -> (i32, i32) {
    %c1_i32 = arith.constant 1 : i32
    %0 = arith.muli %arg0, %c1_i32 : i32
    %1 = arith.addi %0, %arg1 : i32
    %c0_i32 = arith.constant 0 : i32
    %2 = arith.minsi %1, %c0_i32 : i32
    %c0_i32_0 = arith.constant 0 : i32
    %c0_i32_1 = arith.constant 0 : i32
    return %2, %c0_i32_0 : i32, i32
  }
  func.func @transform_3(%arg0: i32, %arg1: i32) -> (i32, i32, i32) {
    %c0_i32 = arith.constant 0 : i32
    %c0_i32_0 = arith.constant 0 : i32
    %c0_i32_1 = arith.constant 0 : i32
    return %arg0, %c0_i32, %c0_i32_0 : i32, i32, i32
  }
}

</mosaic_0001>

<bundles_post_ra>
// kernel: tpu_custom_call.1
= control target key start
LH: loop header
LB: loop body
LE: loop exit
PB: predicated region body
PF: predicated region fallthrough
CT: control target
= control target key end

     0   :  { %8 = vsyncpa [#allocation10], 0  ;;  %s1123_s0 = inlined_call_operand.hbm [shape: f32[2], index: 0, kind: input, shape index: {}]   ;;  %s1124_s1 = inlined_call_operand.hbm [shape: f32[16,128], index: 1, kind: input, shape index: {}]   ;;  %s1125_s2 = inlined_call_operand.hbm [shape: f32[16,128], index: 2, kind: input, shape index: {}]   ;;  %s1126_s3 = inlined_call_operand.hbm [shape: f32[2,40,128], index: 3, kind: output, shape index: {}]  }
   0x1   :  { %9 = vsyncpa [#allocation8], 0 }
   0x2   :  { %11 = vsyncpa [#allocation8 + $0x1], 0 }
   0x3   :  { %12 = vsyncpa [#allocation13], 0 }
   0x4   :  { %14 = vsyncpa [#allocation13 + $0x1], 0 }
   0x5   :  { %15 = vsyncpa [#allocation9], 0 }
   0x6   :  { %17 = vsyncpa [#allocation9 + $0x1], 0  ;;  %s872_s12 = smov 0   ;;  %s874_s13 = smov 0  }
   0x7   :  { %s876_s14 = smov 0   ;;  %s878_s15 = smov 0  }
   0x8   :  { %s880_s16 = smov 0   ;;  %s882_s17 = smov 0  }
   0x9   :  { %s884_s18 = smov 0   ;;  %s886_s19 = smov 0  }
   0xa LB: > { %s529_s20 = sadd.s32 4294967295, %s841_s19   ;;  %s530_s21 = sadd.s32 4294967294, %s841_s19   ;;  %s841_s19 = sphi %s886_s19, %s23_s19   ;;  %s837_s18 = sphi %s884_s18, %s1150_s18   ;;  %s833_s17 = sphi %s882_s17, %s1149_s17   ;;  %s829_s16 = sphi %s880_s16, %s1113_s16   ;;  %s825_s15 = sphi %s878_s15, %s1148_s15   ;;  %s821_s14 = sphi %s876_s14, %s1147_s14   ;;  %s817_s13 = sphi %s874_s13, %s1146_s13   ;;  %s813_s12 = sphi %s872_s12, %s1145_s12  }
   0xb   : > { %p810_p0 = scmp.ne.s32.totalorder %s829_s16, 0  ;;  %p77_p1 = scmp.eq.s32.totalorder %s841_s19, 0 }
   0xc   : > { %p82_p2 = scmp.ne.s32.totalorder %s829_s16, %s825_s15  ;;  %p915_p3 = scmp.eq.s32.totalorder %s529_s20, 0 }
   0xd   : > { %s127_s23 = sadd.s32 1, %s821_s14  ;;  %p920_p4 = por %p810_p0, %p77_p1 }
   0xe   : > { %s1132_s22 = scalar_select %p915_p3, 1, 0 }
   0xf   : > { %p137_p5 = scmp.ne.s32.totalorder %s821_s14, %s817_s13  ;;  %p928_p6 = por %p915_p3, %p82_p2 }
  0x10   : > { %p138_p7 = scmp.eq.s32.totalorder %s529_s20, 1  ;;  %p143_p8 = scmp.ne.s32.totalorder %s817_s13, %s813_s12 }
  0x11   : > { %s1134_s25 = scalar_select %p928_p6, 1, 0 }
  0x12   : > { %p144_p9 = scmp.eq.s32.totalorder %s530_s21, 1  ;;  %p934_p10 = por %p138_p7, %p137_p5 }
  0x13   : > { %p531_p11 = scmp.ge.s32.totalorder %s841_s19, 1  ;;  %p151_p13 = scmp.lt.s32.totalorder %s841_s19, 3 }
  0x14   : > { %s1135_s26 = scalar_select %p934_p10, 1, 0 }
  0x15   : > { %p939_p12 = por %p144_p9, %p143_p8  ;;  %p944_p0 = pnand %p531_p11, %p151_p13 }
  0x16   : > { %p584_p2 = scmp.lt.s32.totalorder %s841_s19, 2  ;;  %s35_s30 = sadd.s32 1, %s837_s18 }
  0x17   : > { %s1136_s27 = scalar_select %p939_p12, 1, 0 }
  0x18   : > { %s1137_s28 = scalar_select %p944_p0, 1, 0 }
  0x19   : > { %p568_p6 = pneg %p944_p0  ;;  %p954_p5 = pnand %p584_p2, %p920_p4 }
  0x1a   : > { %p37_p8 = scmp.ge.s32.totalorder %s35_s30, 2  ;;  %s843_s4 = smov [#allocation7]  }
  0x1b   : > { %p569_p7 = pnand %p568_p6, %p915_p3  ;;  %s844_s9 = smov [#allocation11]  }
  0x1c   : > { %s1152_s30 = smov (%p37_p8, %s35_s30), 0  ;;  %s187_s10 = sshll.u32 %s844_s9, 4  ;;  %s188_s10 = int_to_ptr.vmem [resolvable:$true] %s187_s10 }
  0x1d   : > { %571 = dma.hbm_to_smem (!%p569_p7), %s1123_s0, 16, %s843_s4, [#allocation10]  }
  0x1e   : > { %s124_s7 = ssub.s32 %s837_s18, %s1152_s30  ;;  %s676_s20 = scalar_lea.hbm %s1124_s1, 256 }
  0x1f   : > { %p125_p9 = scmp.eq.s32.totalorder %s124_s7, 0  ;;  %p677_p4 = scmp.ne.s32.totalorder %s1124_s1, %s676_s20 }
  0x20   : > { %p678_p6 = pneg %p954_p5  ;;  %p683_p2 = scmp.lt.s32.totalorder %s676_s20, %s676_s20 }
  0x21   : > { %s969_s8 = scalar_select %p125_p9, %s821_s14, %s127_s23  }
  0x22   : > { %p679_p11 = pnand %p678_p6, %p677_p4 }
  0x24   : > { %p680_p13 = pneg %p679_p11 }
  0x26   : > { %p685_p7 = pnand %p683_p2, %p680_p13 }
  0x28   : > { %688 = shalt.err (!%p685_p7)
}
  0x29   : > { %s689_s23 = scalar_lea.vmem %s188_s10, 256  ;;  %s696_s4 = scalar_lea.vmem %s188_s10, 512 }
  0x2a   : > { %p690_p8 = scmp.ne.s32.totalorder %s188_s10, %s689_s23  ;;  %p697_p12 = scmp.lt.s32.totalorder %s188_s10, %s188_s10 }
  0x2b   : > { %p698_p10 = scmp.lt.s32.totalorder %s696_s4, %s689_s23 }
  0x2c   : > { %p692_p9 = pnand %p690_p8, %p678_p6 }
  0x2d   : > { %p699_p3 = por %p698_p10, %p697_p12 }
  0x2e   : > { %p693_p1 = pneg %p692_p9 }
  0x30   : > { %p700_p0 = pnand %p699_p3, %p693_p1 }
  0x32   : > { %703 = shalt.err (!%p700_p0)
}
  0x33   : > { %s845_s5 = smov 128   ;;  %s846_s6 = smov 8  }
  0x34   : > { %575 = dma.hbm_to_vmem [thread:$0]  (!%p954_p5), %s1124_s1, 256, %s188_s10, [#allocation8], %s845_s5, %s845_s5, %s846_s6  }
  0x35   : > { %s847_s11 = smov [#allocation12]   ;;  %s704_s24 = scalar_lea.hbm %s1125_s2, 256 }
  0x36   : > { %s211_s15 = sshll.u32 %s847_s11, 4  ;;  %p705_p3 = scmp.ne.s32.totalorder %s1125_s2, %s704_s24  ;;  %s212_s15 = int_to_ptr.vmem [resolvable:$true] %s211_s15 }
  0x37   : > { %p711_p0 = scmp.lt.s32.totalorder %s704_s24, %s704_s24 }
  0x38   : > { %p707_p10 = pnand %p705_p3, %p678_p6 }
  0x3a   : > { %p708_p12 = pneg %p707_p10 }
  0x3c   : > { %p713_p1 = pnand %p711_p0, %p708_p12 }
  0x3e   : > { %716 = shalt.err (!%p713_p1)
}
  0x3f   : > { %s717_s7 = scalar_lea.vmem %s212_s15, 256  ;;  %s724_s10 = scalar_lea.vmem %s212_s15, 512 }
  0x40   : > { %p718_p4 = scmp.ne.s32.totalorder %s212_s15, %s717_s7  ;;  %p725_p2 = scmp.lt.s32.totalorder %s212_s15, %s212_s15 }
  0x41   : > { %p726_p7 = scmp.lt.s32.totalorder %s724_s10, %s717_s7 }
  0x42   : > { %p720_p11 = pnand %p718_p4, %p678_p6 }
  0x43   : > { %p727_p8 = por %p726_p7, %p725_p2 }
  0x44   : > { %p721_p13 = pneg %p720_p11 }
  0x46   : > { %p728_p9 = pnand %p727_p8, %p721_p13 }
  0x48   : > { %731 = shalt.err (!%p728_p9)
}
  0x49   : > { %578 = dma.hbm_to_vmem [thread:$0]  (!%p954_p5), %s1125_s2, 256, %s212_s15, [#allocation13], %s845_s5, %s845_s5, %s846_s6  }
  0x4a   : > { %p1139_p3 = scmp.ne.s32.totalorder %s1137_s28, 0 }
  0x4b   : > { %p1140_p10 = scmp.ne.s32.totalorder (!%p1139_p3), %s1132_s22, 0 }
  0x4c   : > { %223 = sbr.rel (%p1139_p3) target bundleno = 163 (0xa3), region = 32 }
  0x51   : > { %795 = dma.done.wait (%p1140_p10), [#allocation10], 16  }
  0x52   : > { %797 = vsyncadd (%p1140_p10), [#allocation10], 4294967280  ;;  %s229_s20 = sand.u32 1, %s829_s16   ;;  %p1141_p6 = scmp.ne.s32.totalorder %s1134_s25, 0 }
  0x53   : > { %s542_s21 = sshll.u32 %s229_s20, 4  ;;  %s230_s24 = scalar_lea.sflag [#allocation8], %s229_s20 }
  0x54   : > { %s1014_s23 = scalar_lea.vmem [#allocation11], %s542_s21 }
  0x55   : > { %799 = dma.done.wait (%p1141_p6), %s230_s24, 256  }
  0x56   : > { %801 = vsyncadd (%p1141_p6), %s230_s24, 4294967040  ;;  %s239_s28 = scalar_lea.sflag [#allocation13], %s229_s20  ;;  %s1020_s29 = scalar_lea.vmem [#allocation12], %s542_s21 }
  0x57   : > { %803 = dma.done.wait (%p1141_p6), %s239_s28, 256  }
  0x58   : > { %805 = vsyncadd (%p1141_p6), %s239_s28, 4294967040 }
  0x59   : > { %247 = sfence }
  0x5a   : > { %s268_s22 = sand.u32 1, %s817_s13   ;;  %s1027_s5 = sld [smem:[#allocation7]]  ;;  %v848_v0 = vmov 0.0  }
  0x5b   : > { %s556_s6 = smul.u32 40, %s268_s22  ;;  %283 = vst [vmem:[#allocation2] sm:$0xff] %v848_v0  ;;  %284 = vst [vmem:[#allocation3] sm:$0xff] %v848_v0  ;;  %s1031_s15 = sld [smem:[#allocation7 + $0x1]] }
  0x5c   : > { %285 = vst [vmem:[#allocation4] sm:$0xff] %v848_v0  ;;  %286 = vst [vmem:[#allocation5] sm:$0xff] %v848_v0  ;;  %s554_s25 = sshll.u32 %s833_s17, 4 }
  0x5d   : > { %287 = vst [vmem:[#allocation6] sm:$0xff] %v848_v0  ;;  %s1036_s4 = sadd.s32 16, %s554_s25  ;;  %s1038_s7 = scalar_lea.vmem [#allocation14], %s556_s6 }
  0x5e   : > { %p546_p5 = scmp.gt.s32.totalorder %s1036_s4, 16 }
  0x60   : > { %296 = sbr.rel (%p546_p5) target bundleno = 113 (0x71), region = 52 }
  0x65   : > { %v297_v1 = vld [vmem:[%s1014_s23] sm:$0xff]  ;;  %v298_v2 = vld [vmem:[%s1014_s23 + $0x8] sm:$0xff]  ;;  %v299_v3 = vstv %s1027_s5  ;;  %v304_v4 = vstv %s1031_s15 }
  0x66   : > { %v300_v5 = vsub.f32 %v297_v1, %v299_v3  ;;  %v301_v6 = vsub.f32 %v298_v2, %v299_v3  ;;  %v302_v7 = vld [vmem:[%s1020_s29] sm:$0xff]  ;;  %v303_v8 = vld [vmem:[%s1020_s29 + $0x8] sm:$0xff] }
  0x67   : > { %v307_v9 = vld [vmem:[#allocation2] sm:$0xff]  ;;  %v305_v10 = vsub.f32 %v302_v7, %v304_v4  ;;  %v306_v11 = vsub.f32 %v303_v8, %v304_v4  ;;  %v311_v13 = vld [vmem:[#allocation3] sm:$0xff]  ;;  %v315_v22 = vld [vmem:[#allocation4] sm:$0xff] }
  0x68   : > { %v308_v12 = vadd.f32 %v301_v6, %v300_v5  ;;  %v328_v14 = vmul.f32 %v300_v5, %v300_v5  ;;  %v329_v15 = vmul.f32 %v301_v6, %v301_v6  ;;  %v327_v20 = vld [vmem:[#allocation6] sm:$0xff]  ;;  %v321_v27 = vld [vmem:[#allocation5] sm:$0xff] }
  0x69   : > { %v312_v16 = vadd.f32 %v306_v11, %v305_v10  ;;  %v316_v17 = vmul.f32 %v305_v10, %v300_v5  ;;  %v317_v18 = vmul.f32 %v306_v11, %v301_v6  ;;  %v322_v19 = vmul.f32 %v305_v10, %v305_v10 }
  0x6a   : > { %v309_v21 = vadd.f32 %v308_v12, %v307_v9  ;;  %v323_v23 = vmul.f32 %v306_v11, %v306_v11  ;;  %v330_v24 = vadd.f32 %v329_v15, %v328_v14 }
  0x6b   : > { %v313_v25 = vadd.f32 %v312_v16, %v311_v13  ;;  %v318_v26 = vadd.f32 %v317_v18, %v316_v17 }
  0x6c   : > { %310 = vst [vmem:[#allocation2] sm:$0xff] %v309_v21  ;;  %v324_v28 = vadd.f32 %v323_v23, %v322_v19  ;;  %v331_v29 = vadd.f32 %v330_v24, %v327_v20 }
  0x6d   : > { %314 = vst [vmem:[#allocation3] sm:$0xff] %v313_v25  ;;  %v319_v30 = vadd.f32 %v318_v26, %v315_v22 }
  0x6e   : > { %v325_v31 = vadd.f32 %v324_v28, %v321_v27  ;;  %332 = vst [vmem:[#allocation6] sm:$0xff] %v331_v29 }
  0x6f   : > { %320 = vst [vmem:[#allocation4] sm:$0xff] %v319_v30 }
  0x70   : > { %326 = vst [vmem:[#allocation5] sm:$0xff] %v325_v31 }
  0x71 PF: > { %p547_p12 = scmp.le.s32.totalorder %s1036_s4, 16 }
  0x73   : > { %336 = sbr.rel (%p547_p12) target bundleno = 138 (0x8a), region = 56 }
  0x78   : > { %v337_v32 = vld [vmem:[%s1014_s23] sm:$0xff]  ;;  %v339_v33 = vstv %s1027_s5  ;;  %v347_v34 = vlaneseq  ;;  %v351_v35 = vstv %s554_s25  ;;  %v344_v37 = vstv %s1031_s15  ;;  %v360_v53 = vld [vmem:[#allocation2] sm:$0xff]  ;;  %v368_v61 = vld [vmem:[#allocation4] sm:$0xff] }
  0x79   : > { %v342_v36 = vld [vmem:[%s1020_s29] sm:$0xff]  ;;  %v338_v38 = vld [vmem:[%s1014_s23 + $0x8] sm:$0xff]  ;;  %v340_v41 = vsub.f32 %v337_v32, %v339_v33 }
  0x7a   : > { %v348_v39 = vshrl.u32 %v347_v34, 7  ;;  %v343_v40 = vld [vmem:[%s1020_s29 + $0x8] sm:$0xff]  ;;  %v345_v42 = vsub.f32 %v342_v36, %v344_v37  ;;  %v341_v45 = vsub.f32 %v338_v38, %v339_v33  ;;  %v364_v55 = vld [vmem:[#allocation3] sm:$0xff]  ;;  %v374_v62 = vld [vmem:[#allocation5] sm:$0xff] }
  0x7b   : > { %v346_v46 = vsub.f32 %v343_v40, %v344_v37  ;;  %v380_v4 = vld [vmem:[#allocation6] sm:$0xff] }
  0x7c   : > { %v349_v43 = vadd.s32 8, %v348_v39  ;;  %v352_v44 = vadd.s32 %v351_v35, %v348_v39 }
  0x7e   : > { %v353_v47 = vadd.s32 %v351_v35, %v349_v43  ;;  %vm354_vm0 = vcmp.lt.s32.totalorder %v352_v44, 16 }
  0x7f   : > { %v356_v48 = vsel %vm354_vm0, %v340_v41, 0.0  ;;  %v358_v49 = vsel %vm354_vm0, %v345_v42, 0.0 }
  0x80   : > { %vm355_vm1 = vcmp.lt.s32.totalorder %v353_v47, 16  ;;  %v369_v50 = vmul.f32 %v358_v49, %v356_v48  ;;  %v375_v51 = vmul.f32 %v358_v49, %v358_v49  ;;  %v381_v56 = vmul.f32 %v356_v48, %v356_v48 }
  0x81   : > { %v357_v52 = vsel %vm355_vm1, %v341_v45, 0.0  ;;  %v359_v54 = vsel %vm355_vm1, %v346_v46, 0.0 }
  0x82   : > { %v361_v57 = vadd.f32 %v357_v52, %v356_v48  ;;  %v365_v58 = vadd.f32 %v359_v54, %v358_v49  ;;  %v370_v59 = vmul.f32 %v359_v54, %v357_v52  ;;  %v376_v60 = vmul.f32 %v359_v54, %v359_v54 }
  0x83   : > { %v382_v63 = vmul.f32 %v357_v52, %v357_v52 }
  0x84   : > { %v362_v0 = vadd.f32 %v361_v57, %v360_v53  ;;  %v366_v1 = vadd.f32 %v365_v58, %v364_v55  ;;  %v371_v2 = vadd.f32 %v370_v59, %v369_v50  ;;  %v377_v3 = vadd.f32 %v376_v60, %v375_v51 }
  0x85   : > { %v383_v5 = vadd.f32 %v382_v63, %v381_v56 }
  0x86   : > { %363 = vst [vmem:[#allocation2] sm:$0xff] %v362_v0  ;;  %367 = vst [vmem:[#allocation3] sm:$0xff] %v366_v1  ;;  %v372_v6 = vadd.f32 %v371_v2, %v368_v61  ;;  %v378_v7 = vadd.f32 %v377_v3, %v374_v62 }
  0x87   : > { %v384_v8 = vadd.f32 %v383_v5, %v380_v4 }
  0x88   : > { %373 = vst [vmem:[#allocation4] sm:$0xff] %v372_v6  ;;  %379 = vst [vmem:[#allocation5] sm:$0xff] %v378_v7 }
  0x89   : > { %385 = vst [vmem:[#allocation6] sm:$0xff] %v384_v8 }
  0x8a PF: > { %s557_s10 = smul.u32 640, %s833_s17  ;;  %s413_s9 = sshll.u32 %s1038_s7, 4  ;;  %s1068_s9 = int_to_ptr.vmem [resolvable:$true] %s413_s9 }
  0x8b   : > { %s1072_s17 = scalar_lea.sflag [#allocation9], %s268_s22  ;;  %s732_s24 = scalar_lea.vmem %s1068_s9, 640 }
  0x8c   : > { %s1066_s21 = scalar_lea.hbm %s1126_s3, %s557_s10  ;;  %p733_p0 = scmp.ne.s32.totalorder %s1068_s9, %s732_s24 }
  0x8d   : > { %v389_v9 = vld [vmem:[#allocation2] sm:$0xff]  ;;  %v391_v10 = vld [vmem:[#allocation3] sm:$0xff]  ;;  %p1142_p1 = scmp.ne.s32.totalorder %s1135_s26, 0  ;;  %s849_s23 = smov [#allocation14]  }
  0x8e   : > { %390 = vst [vmem:[%s1038_s7] sm:$0xff] %v389_v9  ;;  %392 = vst [vmem:[%s1038_s7 + $0x8] sm:$0xff] %v391_v10  ;;  %s736_s28 = sshll.u32 %s849_s23, 4  ;;  %s737_s28 = int_to_ptr.vmem [resolvable:$false] %s736_s28 }
  0x8f   : > { %v393_v11 = vld [vmem:[#allocation4] sm:$0xff]  ;;  %v395_v12 = vld [vmem:[#allocation5] sm:$0xff]  ;;  %p734_p4 = pnand %p733_p0, %p1142_p1  ;;  %s738_s29 = scalar_lea.vmem %s737_s28, 1280 }
  0x90   : > { %394 = vst [vmem:[%s1038_s7 + $0x10] sm:$0xff] %v393_v11  ;;  %v397_v13 = vld [vmem:[#allocation6] sm:$0xff]  ;;  %396 = vst [vmem:[%s1038_s7 + $0x18] sm:$0xff] %v395_v12  ;;  %p739_p13 = scmp.lt.s32.totalorder %s1068_s9, %s737_s28  ;;  %p740_p2 = scmp.lt.s32.totalorder %s738_s29, %s732_s24 }
  0x91   : > { %398 = vst [vmem:[%s1038_s7 + $0x20] sm:$0xff] %v397_v13  ;;  %p735_p11 = pneg %p734_p4 }
  0x92   : > { %p741_p7 = por %p740_p2, %p739_p13 }
  0x94   : > { %p742_p8 = pnand %p741_p7, %p735_p11 }
  0x96   : > { %745 = shalt.err (!%p742_p8)
}
  0x97   : > { %s746_s22 = scalar_lea.hbm %s1066_s21, 640  ;;  %s750_s15 = scalar_lea.hbm %s1126_s3, 1280 }
  0x98   : > { %p747_p9 = scmp.ne.s32.totalorder %s1066_s21, %s746_s22  ;;  %p751_p6 = scmp.lt.s32.totalorder %s1066_s21, %s1126_s3 }
  0x99   : > { %p752_p5 = scmp.lt.s32.totalorder %s750_s15, %s746_s22 }
  0x9a   : > { %p748_p3 = pnand %p747_p9, %p1142_p1 }
  0x9b   : > { %p753_p12 = por %p752_p5, %p751_p6 }
  0x9c   : > { %p749_p10 = pneg %p748_p3 }
  0x9e   : > { %p754_p0 = pnand %p753_p12, %p749_p10 }
  0xa0   : > { %757 = shalt.err (!%p754_p0)
}
  0xa1   : > { %s850_s7 = smov 128   ;;  %s851_s10 = smov 8  }
  0xa2   : > { %566 = dma.vmem_to_hbm [thread:$0]  (%p1142_p1), %s1068_s9, 640, %s1066_s21, %s1072_s17, %s850_s7, %s850_s7, %s851_s10  }
  0xa3 PF: > { %s428_s11 = sand.u32 1, %s813_s12   ;;  %p1143_p4 = scmp.ne.s32.totalorder %s1136_s27, 0 }
  0xa4   : > { %p1144_p11 = scmp.ge.s32.totalorder %s841_s19, 2  ;;  %s429_s20 = scalar_lea.sflag [#allocation9], %s428_s11 }
  0xa6   : > { %p580_p13 = pnand %p1144_p11, %p1143_p4 }
  0xa8   : > { %p581_p2 = pneg %p580_p13 }
  0xaa   : > { %807 = dma.done.wait (%p581_p2), %s429_s20, 640  }
  0xab   : > { %809 = vsyncadd (%p581_p2), %s429_s20, 4294966656  ;;  %s23_s19 = sadd.s32 1, %s841_s19   ;;  %s1145_s12 = smov %s817_s13 }
  0xac   : > { %p20_p7 = scmp.ge.s32.totalorder %s23_s19, 4   ;;  %s1146_s13 = smov %s821_s14 }
  0xad   : > { %s1147_s14 = smov %s969_s8  ;;  %s1148_s15 = smov %s829_s16 }
  0xae   : > { %s1113_s16 = smov 0   ;;  %s1149_s17 = smov %s837_s18 }
  0xaf   : > { %s1150_s18 = smov %s1152_s30  ;;  %22 = sbr.rel (!%p20_p7) target bundleno = 10 (0xa), region = 111 }
  0xb4   :  { %434 = vsyncpa [#allocation8], 1 }
  0xb5   :  { %436 = vsyncpa [#allocation8 + $0x1], 1 }
  0xb6   :  { %437 = vsyncpa [#allocation13], 1 }
  0xb7   :  { %439 = vsyncpa [#allocation13 + $0x1], 1 }
  0xb8   :  { %440 = vsyncpa [#allocation9], 1 }
  0xb9   :  { %442 = vsyncpa [#allocation9 + $0x1], 1 }
  0xba   :  { %443 = vsyncpa [#allocation10], 1 }
  0xbb   :  { %445 = vsyncpa [#allocation10 + $0x1], 1 }

</bundles_post_ra>
